<compile_context>
chip_gen: v7x
topology: tpu7x:2x2x1
jax: 0.10.0
libtpu: 0.0.40
codegen_flags: <defaults>
</compile_context>

<pallas_src>
import functools

import jax
import jax.numpy as jnp
from jax.experimental import pallas as pl
from jax.experimental.pallas import tpu as pltpu


def _round_up(x, m):
    return -(-x // m) * m


def _rpn_fused_heads_kernel(x_ref, w_ref, b_ref, cls_ref, reg_ref, *, oc, oc_pad, orr):
    """One (batch, spatial-tile) grid step.

    x_ref:   [C, Ts]      native feature dtype (f32)
    w_ref:   [O_pad, C]   compute dtype (bf16); cls rows [0:oc], reg rows [oc_pad:oc_pad+orr]
    b_ref:   [O_pad, 1]   f32
    cls_ref: [oc, Ts]     out dtype
    reg_ref: [orr, Ts]    out dtype
    """
    # Cast on the VPU so the HBM read of x stays in its native dtype (no
    # standalone XLA cast pass over the whole feature map).
    x = x_ref[...].astype(w_ref.dtype)
    # One fused dot for both heads; f32 accumulate + f32 bias add.
    y = jnp.dot(w_ref[...], x, preferred_element_type=jnp.float32) + b_ref[...]
    # Split the fused result.  oc_pad is a multiple of 8, so the reg slice
    # starts on a sublane-tile boundary.
    cls_ref[...] = y[:oc, :].astype(cls_ref.dtype)
    reg_ref[...] = y[oc_pad:oc_pad + orr, :].astype(reg_ref.dtype)


def _vmem_stream_budget_bytes():
    """Pipelined-stream VMEM budget that is safe on v5e/v6e/v7x scoped defaults."""
    budget = 12 << 20
    try:  # best-effort hardware query (v7x has only 64 MiB physical VMEM)
        cap = pltpu.get_tpu_info().vmem_capacity_bytes
        budget = min(budget, max(cap // 5, 2 << 20))
    except Exception:
        pass
    return budget


def _plan_spatial_tile(S, C, oc, orr, o_pad, in_itemsize, out_itemsize, batch,
                       max_tile=8192):
    """Pick a lane-dense spatial tile.

    The tile is either the full extent S (always legal) or a multiple of 128;
    partial trailing blocks are fine because the spatial axis is a pure map
    axis (garbage OOB lanes of the last block only affect masked-out output).
    """
    assert max_tile % 128 == 0
    # VMEM bytes per spatial lane: double-buffered x and output streams plus
    # the single fused f32 result tile.
    per_lane = 2 * (C * in_itemsize + (oc + orr) * out_itemsize) + o_pad * 4
    tile_by_vmem = max(128, (_vmem_stream_budget_bytes() // per_lane) // 128 * 128)
    tile_cap = min(max_tile, tile_by_vmem)

    tile = S if S <= tile_cap else tile_cap

    # v7x has 2 TensorCores: guarantee >= 2 grid steps along the "parallel"
    # axes when the batch alone does not provide them.
    if batch == 1 and tile == S and S > 128:
        n_blocks = pl.cdiv(S, 128)
        tile = pl.cdiv(n_blocks, 2) * 128
    return tile


def conv1x1_fused_heads_pallas(x_bcs, w_all, b_all, *, oc, orr, oc_pad,
                               out_dtype=jnp.float32, max_tile=8192):
    """x_bcs: [B, C, S] (native dtype); w_all: [O_pad, C]; b_all: [O_pad, 1] f32.

    Returns (cls [B, oc, S], reg [B, orr, S]) in out_dtype.
    """
    B, C, S = x_bcs.shape
    o_pad = w_all.shape[0]
    assert o_pad % 8 == 0 and oc_pad % 8 == 0 and oc_pad + orr <= o_pad

    in_itemsize = jnp.dtype(x_bcs.dtype).itemsize
    out_itemsize = jnp.dtype(out_dtype).itemsize
    tile = _plan_spatial_tile(S, C, oc, orr, o_pad, in_itemsize, out_itemsize,
                              B, max_tile)
    grid = (B, pl.cdiv(S, tile))

    cost = pl.CostEstimate(
        flops=2 * B * S * C * o_pad,
        transcendentals=0,
        bytes_accessed=(B * C * S * in_itemsize                              # features (read once)
                        + o_pad * C * jnp.dtype(w_all.dtype).itemsize        # fused weights
                        + o_pad * 4                                          # fused bias
                        + B * (oc + orr) * S * out_itemsize),                # outputs
    )

    kernel = functools.partial(_rpn_fused_heads_kernel, oc=oc, oc_pad=oc_pad, orr=orr)

    return pl.pallas_call(
        kernel,
        out_shape=(
            jax.ShapeDtypeStruct((B, oc, S), out_dtype),
            jax.ShapeDtypeStruct((B, orr, S), out_dtype),
        ),
        grid_spec=pltpu.PrefetchScalarGridSpec(
            num_scalar_prefetch=0,
            grid=grid,
            in_specs=[
                # TODO(synk): consider pipeline_mode=pl.Buffered(3) on this spec
                # to hide DMA turnaround gaps once validated on the target rev.
                pl.BlockSpec((None, C, tile), lambda b, s: (b, 0, s)),
                pl.BlockSpec((o_pad, C), lambda b, s: (0, 0)),   # resident weights
                pl.BlockSpec((o_pad, 1), lambda b, s: (0, 0)),   # resident bias
            ],
            out_specs=[
                pl.BlockSpec((None, oc, tile), lambda b, s: (b, 0, s)),
                pl.BlockSpec((None, orr, tile), lambda b, s: (b, 0, s)),
            ],
        ),
        compiler_params=pltpu.CompilerParams(
            dimension_semantics=("parallel", "parallel"),
        ),
        cost_estimate=cost,
    )(x_bcs, w_all, b_all)


def init_rpn_params(key, input_channels, anchor_count):
    """Synthetic parameters in the PyTorch conv layout: weight [out_ch, in_ch]."""
    k1, k2, k3, k4 = jax.random.split(key, 4)
    cls_out, reg_out = 2 * anchor_count, 4 * anchor_count
    bound = 1.0 / jnp.sqrt(jnp.float32(input_channels))
    return dict(
        w_cls=jax.random.uniform(k1, (cls_out, input_channels), jnp.float32, -bound, bound),
        b_cls=jax.random.uniform(k2, (cls_out,), jnp.float32, -bound, bound),
        w_reg=jax.random.uniform(k3, (reg_out, input_channels), jnp.float32, -bound, bound),
        b_reg=jax.random.uniform(k4, (reg_out,), jnp.float32, -bound, bound),
    )


def prepare_rpn_params(params, compute_dtype=jnp.bfloat16):
    """Once-per-model prep: fuse + sublane-pad both heads into one weight/bias pair."""
    w_cls, w_reg = params["w_cls"], params["w_reg"]
    oc, c = w_cls.shape
    orr = w_reg.shape[0]
    oc_pad = _round_up(oc, 8)
    o_pad = _round_up(oc_pad + orr, 8)
    w_all = jnp.zeros((o_pad, c), compute_dtype)
    w_all = w_all.at[:oc].set(w_cls.astype(compute_dtype))
    w_all = w_all.at[oc_pad:oc_pad + orr].set(w_reg.astype(compute_dtype))
    b_all = jnp.zeros((o_pad, 1), jnp.float32)
    b_all = b_all.at[:oc, 0].set(params["b_cls"].astype(jnp.float32))
    b_all = b_all.at[oc_pad:oc_pad + orr, 0].set(params["b_reg"].astype(jnp.float32))
    return dict(w_all=w_all, b_all=b_all)


@functools.partial(jax.jit, static_argnames=("anchor_count", "out_dtype"))
def rpn_forward(features, prepared_params, anchor_count, out_dtype=jnp.float32):
    """features: NCHW [B, C, H, W] in its native dtype (no pre-cast).

    Returns (class_predictions [B, 2, A, H, W], region_predictions [B, 4, A, H, W]).
    """
    B, C, H, W = features.shape
    A = anchor_count
    oc, orr = 2 * A, 4 * A
    oc_pad = _round_up(oc, 8)

    x = features.reshape(B, C, H * W)            # free view of NCHW
    cls_flat, reg_flat = conv1x1_fused_heads_pallas(
        x, prepared_params["w_all"], prepared_params["b_all"],
        oc=oc, orr=orr, oc_pad=oc_pad, out_dtype=out_dtype)

    # Same semantics as torch `.view((B, 2, A, H, W))` / `.view((B, 4, A, H, W))`.
    class_predictions = cls_flat.reshape(B, 2, A, H, W)
    region_predictions = reg_flat.reshape(B, 4, A, H, W)
    return class_predictions, region_predictions


if __name__ == "__main__":
    B, C, H, W = 2, 4, 16, 16
    anchor_count = 3

    key = jax.random.PRNGKey(0)
    kx, kp = jax.random.split(key)
    features = jax.random.normal(kx, (B, C, H, W), dtype=jnp.float32)
    params = init_rpn_params(kp, C, anchor_count)
    prepared = prepare_rpn_params(params, compute_dtype=jnp.bfloat16)

    cls_pred, reg_pred = rpn_forward(features, prepared, anchor_count)
    jax.block_until_ready((cls_pred, reg_pred))

    assert cls_pred.shape == (B, 2, anchor_count, H, W)
    assert reg_pred.shape == (B, 4, anchor_count, H, W)
    assert cls_pred.dtype == jnp.float32 and reg_pred.dtype == jnp.float32

    # Tight reference: same bf16-operand / f32-accumulate math, pure JAX.
    xb = features.astype(jnp.bfloat16).astype(jnp.float32)
    wcb = params["w_cls"].astype(jnp.bfloat16).astype(jnp.float32)
    wrb = params["w_reg"].astype(jnp.bfloat16).astype(jnp.float32)
    ref_cls = (jnp.einsum("oc,bchw->bohw", wcb, xb)
               + params["b_cls"][None, :, None, None]).reshape(B, 2, anchor_count, H, W)
    ref_reg = (jnp.einsum("oc,bchw->bohw", wrb, xb)
               + params["b_reg"][None, :, None, None]).reshape(B, 4, anchor_count, H, W)
    assert jnp.allclose(cls_pred, ref_cls, atol=1e-4, rtol=1e-4)
    assert jnp.allclose(reg_pred, ref_reg, atol=1e-4, rtol=1e-4)

    # Loose sanity check against the full-f32 reference (bf16 rounding only).
    ref_cls_f32 = (jnp.einsum("oc,bchw->bohw", params["w_cls"], features)
                   + params["b_cls"][None, :, None, None]).reshape(B, 2, anchor_count, H, W)
    ref_reg_f32 = (jnp.einsum("oc,bchw->bohw", params["w_reg"], features)
                   + params["b_reg"][None, :, None, None]).reshape(B, 4, anchor_count, H, W)
    assert jnp.allclose(cls_pred, ref_cls_f32, atol=3e-2, rtol=3e-2)
    assert jnp.allclose(reg_pred, ref_reg_f32, atol=3e-2, rtol=3e-2)

    # Optional bf16-output path (halves output writeback when downstream accepts it).
    cls_bf16, reg_bf16 = rpn_forward(features, prepared, anchor_count,
                                     out_dtype=jnp.bfloat16)
    jax.block_until_ready((cls_bf16, reg_bf16))
    assert cls_bf16.dtype == jnp.bfloat16 and reg_bf16.dtype == jnp.bfloat16
    assert jnp.allclose(cls_bf16.astype(jnp.float32), cls_pred, atol=1e-2, rtol=1e-2)
    assert jnp.allclose(reg_bf16.astype(jnp.float32), reg_pred, atol=1e-2, rtol=1e-2)

    print("KERNEL_OK")
</pallas_src>

<mosaic_0001>
module attributes {stable_mosaic.version = 11 : i64} {
  func.func @_rpn_fused_heads_kernel(%arg0: i32, %arg1: i32, %arg2: memref<1x4x256xf32, #tpu.memory_space<vmem>>, %arg3: memref<24x4xbf16, #tpu.memory_space<vmem>>, %arg4: memref<24x1xf32, #tpu.memory_space<vmem>>, %arg5: memref<1x6x256xf32, #tpu.memory_space<vmem>>, %arg6: memref<1x12x256xf32, #tpu.memory_space<vmem>>) attributes {dimension_semantics = [#tpu.dimension_semantics<parallel>, #tpu.dimension_semantics<parallel>], iteration_bounds = array<i64: 2, 1>, scalar_prefetch = 0 : i64, scratch_operands = 0 : i64, tpu.core_type = #tpu.core_type<tc>, window_params = [{transform_indices = @transform_0, window_bounds = array<i64: 1, 4, 256>}, {pipeline_mode = #tpu.pipeline_mode<synchronous>, transform_indices = @transform_1, window_bounds = array<i64: 24, 4>}, {pipeline_mode = #tpu.pipeline_mode<synchronous>, transform_indices = @transform_2, window_bounds = array<i64: 24, 1>}, {transform_indices = @transform_3, window_bounds = array<i64: 1, 6, 256>}, {transform_indices = @transform_4, window_bounds = array<i64: 1, 12, 256>}]} {
    %c0 = arith.constant 0 : index
    %c0_0 = arith.constant 0 : index
    %c0_1 = arith.constant 0 : index
    %0 = vector.load %arg2[%c0, %c0_0, %c0_1] : memref<1x4x256xf32, #tpu.memory_space<vmem>>, vector<1x4x256xf32>
    %1 = vector.shape_cast %0 : vector<1x4x256xf32> to vector<4x256xf32>
    %2 = arith.truncf %1 : vector<4x256xf32> to vector<4x256xbf16>
    %c0_2 = arith.constant 0 : index
    %c0_3 = arith.constant 0 : index
    %3 = vector.load %arg3[%c0_2, %c0_3] : memref<24x4xbf16, #tpu.memory_space<vmem>>, vector<24x4xbf16>
    %cst = arith.constant dense<0.000000e+00> : vector<24x256xf32>
    %4 = tpu.matmul %3, %2, %cst {dimension_numbers = #tpu.dot_dimension_numbers<[1], [0], [0], [1], [0, 0, 1, 1], [], []>} : vector<24x4xbf16>, vector<4x256xbf16>, vector<24x256xf32> -> vector<24x256xf32>
    %c0_4 = arith.constant 0 : index
    %c0_5 = arith.constant 0 : index
    %5 = vector.load %arg4[%c0_4, %c0_5] : memref<24x1xf32, #tpu.memory_space<vmem>>, vector<24x1xf32>
    %6 = vector.broadcast %5 : vector<24x1xf32> to vector<24x256xf32>
    %7 = arith.addf %4, %6 : vector<24x256xf32>
    %8 = vector.extract_strided_slice %7 {offsets = [0, 0], sizes = [6, 256], strides = [1, 1]} : vector<24x256xf32> to vector<6x256xf32>
    %c0_6 = arith.constant 0 : index
    %c0_7 = arith.constant 0 : index
    %c0_8 = arith.constant 0 : index
    %9 = vector.load %arg5[%c0_6, %c0_7, %c0_8] : memref<1x6x256xf32, #tpu.memory_space<vmem>>, vector<1x6x256xf32>
    %10 = vector.shape_cast %9 : vector<1x6x256xf32> to vector<6x256xf32>
    %11 = vector.shape_cast %8 : vector<6x256xf32> to vector<1x6x256xf32>
    tpu.vector_store %arg5[%c0_6, %c0_7, %c0_8], %11 {strides = array<i32>} : memref<1x6x256xf32, #tpu.memory_space<vmem>>, vector<1x6x256xf32>,
    %12 = vector.extract_strided_slice %7 {offsets = [8, 0], sizes = [12, 256], strides = [1, 1]} : vector<24x256xf32> to vector<12x256xf32>
    %c0_9 = arith.constant 0 : index
    %c0_10 = arith.constant 0 : index
    %c0_11 = arith.constant 0 : index
    %13 = vector.load %arg6[%c0_9, %c0_10, %c0_11] : memref<1x12x256xf32, #tpu.memory_space<vmem>>, vector<1x12x256xf32>
    %14 = vector.shape_cast %13 : vector<1x12x256xf32> to vector<12x256xf32>
    %15 = vector.shape_cast %12 : vector<12x256xf32> to vector<1x12x256xf32>
    tpu.vector_store %arg6[%c0_9, %c0_10, %c0_11], %15 {strides = array<i32>} : memref<1x12x256xf32, #tpu.memory_space<vmem>>, vector<1x12x256xf32>,
    return
  }
  func.func @transform_0(%arg0: i32, %arg1: i32) -> (i32, i32, i32) {
    %c0_i32 = arith.constant 0 : i32
    %c0_i32_0 = arith.constant 0 : i32
    return %arg0, %c0_i32, %arg1 : i32, i32, i32
  }
  func.func @transform_1(%arg0: i32, %arg1: i32) -> (i32, i32) {
    %c0_i32 = arith.constant 0 : i32
    %c0_i32_0 = arith.constant 0 : i32
    %c0_i32_1 = arith.constant 0 : i32
    return %c0_i32, %c0_i32_0 : i32, i32
  }
  func.func @transform_2(%arg0: i32, %arg1: i32) -> (i32, i32) {
    %c0_i32 = arith.constant 0 : i32
    %c0_i32_0 = arith.constant 0 : i32
    %c0_i32_1 = arith.constant 0 : i32
    return %c0_i32, %c0_i32_0 : i32, i32
  }
  func.func @transform_3(%arg0: i32, %arg1: i32) -> (i32, i32, i32) {
    %c0_i32 = arith.constant 0 : i32
    %c0_i32_0 = arith.constant 0 : i32
    return %arg0, %c0_i32, %arg1 : i32, i32, i32
  }
  func.func @transform_4(%arg0: i32, %arg1: i32) -> (i32, i32, i32) {
    %c0_i32 = arith.constant 0 : i32
    %c0_i32_0 = arith.constant 0 : i32
    return %arg0, %c0_i32, %arg1 : i32, i32, i32
  }
}

</mosaic_0001>

<bundles_post_ra>
// kernel: rpn_forward.1
= control target key start
LH: loop header
LB: loop body
LE: loop exit
PB: predicated region body
PF: predicated region fallthrough
CT: control target
= control target key end

     0   :  { %s608_s15 = smov 0   ;;  %s610_s16 = smov 0   ;;  %s664_s0 = inlined_call_operand.vmem [shape: f32[2,4,256], index: 0, kind: input, shape index: {}]   ;;  %s665_s1 = inlined_call_operand.vmem [shape: bf16[24,4], index: 1, kind: input, shape index: {}]   ;;  %s666_s2 = inlined_call_operand.vmem [shape: f32[24,1], index: 2, kind: input, shape index: {}]   ;;  %s667_s3 = inlined_call_operand.vmem [shape: f32[2,6,256], index: 3, kind: output, shape index: {0}]   ;;  %s668_s4 = inlined_call_operand.vmem [shape: f32[2,12,256], index: 4, kind: output, shape index: {1}]  }
   0x1   :  { %s612_s17 = smov 0  }
   0x2 LB: > { %s27_s18 = sadd.s32 1, %s576_s16  ;;  %p509_p0 = scmp.ge.s32.totalorder %s580_s17, 1  ;;  %s580_s17 = sphi %s612_s17, %s15_s17   ;;  %s576_s16 = sphi %s610_s16, %s670_s16   ;;  %s572_s15 = sphi %s608_s15, %s669_s15  }
   0x3   : > { %p29_p1 = scmp.ge.s32.totalorder %s27_s18, 2  ;;  %p188_p2 = scmp.lt.s32.totalorder %s580_s17, 3 }
   0x5   : > { %s672_s18 = smov (%p29_p1, %s27_s18), 0  ;;  %p189_p3 = pnand %p509_p0, %p188_p2 }
   0x6   : > { %p232_p4 = scmp.lt.s32.totalorder (!%p189_p3), %s572_s15, 1  ;;  %v582_v0 = vmov (!%p189_p3), 0   ;;  %v271_v1 = vld [vmem:[%s666_s2] sm:$0xff] (!%p189_p3)  ;;  %v273_v2 = vld [vmem:[%s666_s2 + $0x10] sm:$0xff] (!%p189_p3)  ;;  %v272_v3 = vld [vmem:[%s666_s2 + $0x8] sm:$0xff] (!%p189_p3)  ;;  %vm304_vm0 = vcmask (!%p189_p3), 1041408  }
   0x7   : > { %192 = sbr.rel (%p189_p3) target bundleno = 244 (0xf4), region = 32  ;;  %343 = vmatprep.mubr.bf16.mxu0 (!%p189_p3), %v582_v0  ;;  %353 = vmatprep.mubr.bf16.mxu1 (!%p189_p3), %v582_v0  ;;  %v556_v9 = vld [vmem:[%s665_s1] sm:$0xff] (!%p189_p3)   ;;  %v557_v10 = vld [vmem:[%s665_s1 + $0x8] ss:$0 sps:$4 sm:$0xff] (!%p189_p3)   ;;  %vm297_vm1 = vcmask (!%p189_p3), 31744  }
   0x8   : > { %553 = vset.pattern.permute.xlu0 (!%p189_p3), %v582_v0  ;;  %554 = vset.pattern.permute.xlu1 (!%p189_p3), %v582_v0 }
   0x9   : > { %276 = vperm.xlu0 (!%p189_p3), %553, %v271_v1   ;;  %286 = vperm.xlu1 (!%p189_p3), %554, %v273_v2  }
   0xd   : > { %281 = vperm.xlu0 (!%p189_p3), %553, %v272_v3  }
   0xe   : > { %s674_s15 = smov (!%p232_p4, %s572_s15), 1 }
   0xf   : > { %s523_s23 = sshll.u32 %s674_s15, 3  ;;  %s524_s7 = sshll.u32 %s674_s15, 4 }
  0x10   : > { %s239_s28 = scalar_lea.vmem %s664_s0, %s523_s23  ;;  %s525_s8 = sshll.u32 %s674_s15, 5 }
  0x11   : > { %v262_v4 = vld [vmem:[%s239_s28] sm:$0xff]  ;;  %s249_s11 = scalar_lea.vmem %s667_s3, %s524_s7  ;;  %s259_s14 = scalar_lea.vmem %s668_s4, %s525_s8 }
  0x12   : > { %v264_v5 = vcombine.high %v262_v4, %v262_v4  ;;  %v266_v6 = vpack.c.bf16 %v262_v4, %v262_v4 }
  0x14   : > { %v267_v7 = vpack.c.bf16 %v264_v5, %v264_v5  ;;  %v306_v8 = vsel %vm304_vm0, %v266_v6, 0 }
  0x16   : > { %518 = vmatprep.subr.msk.bf16.mxu0 %vm304_vm0, %v267_v7  ;;  %526 = vmatprep.subr.msk.bf16.mxu1 %vm304_vm0, %v267_v7 }
  0x17   : > { %312 = vmatpush1.bf16.msra.mxu0 %v306_v8  ;;  %527 = vmatpush1.bf16.msra.mxu1 %v306_v8 }
  0x1a   : > { %519 = vmatmul.mubr.msk.bf16.vlgmr.msra.gmra.mrb[0].mxu0 %vm297_vm1, %v556_v9  ;;  %520 = vmatmul.mubr.msk.bf16.vlgmr.msra.gmra.mrb[0].mxu1 %vm297_vm1, %v557_v10 }
  0x88   : > { %v277_v11 = vpop.permute.xlu0 %276  ;;  %v287_v12 = vpop.permute.xlu1 %286 }
  0x8c   : > { %v282_v13 = vpop.permute.xlu0 %281 }
  0xed   : > { %v345_v14 = vpop.f32.mrb[0].mxu0  ;;  %v355_v15 = vpop.f32.mrb[0].mxu1 }
  0xee   : > { %v346_v16 = vadd.f32 %v345_v14, %v277_v11  ;;  %v347_v17 = vpop.f32.mrb[1].mxu0  ;;  %v357_v18 = vpop.f32.mrb[1].mxu1  ;;  %v356_v19 = vadd.f32 %v355_v15, %v287_v12 }
  0xef   : > { %v348_v20 = vadd.f32 %v347_v17, %v277_v11  ;;  %v358_v21 = vadd.f32 %v357_v18, %v287_v12  ;;  %v349_v22 = vpop.f32.mrb[2].mxu0  ;;  %v359_v23 = vpop.f32.mrb[2].mxu1 }
  0xf0   : > { %362 = vst [vmem:[%s249_s11] sm:$0x3f] %v346_v16  ;;  %366 = vst [vmem:[%s259_s14 + $0x10] sm:$0xf] %v356_v19  ;;  %v350_v24 = vadd.f32 %v349_v22, %v282_v13  ;;  %v351_v25 = vpop.f32.mrb[3].mxu0  ;;  %v360_v26 = vpop.f32.mrb[3].mxu1 }
  0xf1   : > { %363 = vst [vmem:[%s249_s11 + $0x8] sm:$0x3f] %v348_v20  ;;  %367 = vst [vmem:[%s259_s14 + $0x18] sm:$0xf] %v358_v21  ;;  %v352_v27 = vadd.f32 %v351_v25, %v282_v13 }
  0xf2   : > { %364 = vst [vmem:[%s259_s14] sm:$0xff] %v350_v24 }
  0xf3   : > { %365 = vst [vmem:[%s259_s14 + $0x8] sm:$0xff] %v352_v27 }
  0xf4 PF: > { %s15_s17 = sadd.s32 1, %s580_s17   ;;  %s669_s15 = smov %s576_s16 }
  0xf5   : > { %p12_p5 = scmp.ge.s32.totalorder %s15_s17, 4   ;;  %s670_s16 = smov %s672_s18 }
  0xf7   :  { %14 = sbr.rel (!%p12_p5) target bundleno = 2 (0x2), region = 74 }

</bundles_post_ra>
